<compile_context>
chip_gen: v6e
topology: v6e:2x2x1
jax: 0.10.0
libtpu: 0.0.40
codegen_flags: <defaults>
</compile_context>

<pallas_src>
import math

import jax
import jax.numpy as jnp
from jax.experimental import pallas as pl
from jax.experimental.pallas import tpu as pltpu


def _film_kernel_gamma_beta(x_ref, wg_ref, wb_ref, bg_ref, bb_ref,
                            gamma_ref, beta_ref):
    x = x_ref[...]
    if x.dtype != wg_ref.dtype:          # static (trace-time) dtype check
        x = x.astype(wg_ref.dtype)
    gamma_ref[...] = (
        jnp.dot(x, wg_ref[...], preferred_element_type=jnp.float32) + bg_ref[...]
    ).astype(gamma_ref.dtype)
    beta_ref[...] = (
        jnp.dot(x, wb_ref[...], preferred_element_type=jnp.float32) + bb_ref[...]
    ).astype(beta_ref.dtype)


def _film_kernel_gamma(x_ref, wg_ref, bg_ref, gamma_ref):
    x = x_ref[...]
    if x.dtype != wg_ref.dtype:
        x = x.astype(wg_ref.dtype)
    gamma_ref[...] = (
        jnp.dot(x, wg_ref[...], preferred_element_type=jnp.float32) + bg_ref[...]
    ).astype(gamma_ref.dtype)


def film_forward(sigma_encoding, weight, bias, *, output_dim, film_bias=True,
                 block_b=512, weight_dtype=None):
    """Film.forward.

    sigma_encoding: [B, emb_dim] f32
    weight:         [out_features, emb_dim]  (PyTorch nn.Linear layout)
    bias:           [out_features]
    out_features = 2*output_dim if film_bias else output_dim.
    Returns (gamma, beta), each [B, output_dim, 1]; beta is None if not film_bias.
    """
    B, E = sigma_encoding.shape
    out_features = weight.shape[0]
    assert weight.shape[1] == E
    assert out_features == (2 * output_dim if film_bias else output_dim)

    wdt = jnp.dtype(weight_dtype) if weight_dtype is not None else weight.dtype
    wt = weight.astype(wdt).T                               # [E, out_features]
    b2d = bias.astype(jnp.float32).reshape(1, out_features)  # [1, out_features]

    # Batch tiling: one block if small, otherwise pipeline TB-row tiles.
    tb = B if B <= block_b else block_b
    grid = (pl.cdiv(B, tb),)

    x_spec = pl.BlockSpec((tb, E), lambda i: (i, 0))
    w_spec = pl.BlockSpec((E, output_dim), lambda i: (0, 0))      # VMEM-resident
    bias_spec = pl.BlockSpec((1, output_dim), lambda i: (0, 0))   # VMEM-resident
    out_spec = pl.BlockSpec((tb, output_dim), lambda i: (i, 0))
    out_shape = jax.ShapeDtypeStruct((B, output_dim), jnp.float32)

    compiler_params = pltpu.CompilerParams(dimension_semantics=("parallel",))
    cost = pl.CostEstimate(
        flops=2 * B * E * out_features,
        transcendentals=0,
        bytes_accessed=int(wdt.itemsize * E * out_features
                           + 4 * (B * E + out_features + B * out_features)),
    )

    if film_bias:
        wg, wb = wt[:, :output_dim], wt[:, output_dim:]
        bg, bb = b2d[:, :output_dim], b2d[:, output_dim:]
        gamma, beta = pl.pallas_call(
            _film_kernel_gamma_beta,
            out_shape=(out_shape, out_shape),
            grid=grid,
            in_specs=[x_spec, w_spec, w_spec, bias_spec, bias_spec],
            out_specs=(out_spec, out_spec),
            compiler_params=compiler_params,
            cost_estimate=cost,
        )(sigma_encoding, wg, wb, bg, bb)
        # unsqueeze(-1) done outside the kernel (keeps kernel outputs lane-dense)
        return gamma[..., None], beta[..., None]
    else:
        gamma = pl.pallas_call(
            _film_kernel_gamma,
            out_shape=out_shape,
            grid=grid,
            in_specs=[x_spec, w_spec, bias_spec],
            out_specs=out_spec,
            compiler_params=compiler_params,
            cost_estimate=cost,
        )(sigma_encoding, wt, b2d)
        return gamma[..., None], None


def reference_film(sigma_encoding, weight, bias, *, output_dim, film_bias=True):
    """Plain-JAX mirror of the PyTorch forward."""
    y = sigma_encoding @ weight.T + bias
    y = y[..., None]
    if film_bias:
        return y[:, :output_dim, :], y[:, output_dim:, :]
    return y, None


if __name__ == "__main__":
    B, emb_dim, output_dim = 8, 32, 128

    key = jax.random.PRNGKey(0)
    k_x, k_w, k_b, k_w2, k_b2 = jax.random.split(key, 5)

    sigma_encoding = jax.random.normal(k_x, (B, emb_dim), dtype=jnp.float32)

    # PyTorch Linear default init: U(-1/sqrt(in), 1/sqrt(in))
    bound = 1.0 / math.sqrt(float(emb_dim))
    w = jax.random.uniform(k_w, (2 * output_dim, emb_dim), jnp.float32, -bound, bound)
    b = jax.random.uniform(k_b, (2 * output_dim,), jnp.float32, -bound, bound)

    # bias=True path (gamma, beta)
    gamma, beta = film_forward(sigma_encoding, w, b,
                               output_dim=output_dim, film_bias=True)
    gamma, beta = jax.block_until_ready((gamma, beta))
    g_ref, b_ref = reference_film(sigma_encoding, w, b,
                                  output_dim=output_dim, film_bias=True)
    assert gamma.shape == (B, output_dim, 1) and beta.shape == (B, output_dim, 1)
    assert gamma.dtype == jnp.float32 and beta.dtype == jnp.float32
    assert jnp.allclose(gamma, g_ref, atol=1e-5, rtol=1e-5)
    assert jnp.allclose(beta, b_ref, atol=1e-5, rtol=1e-5)

    # bias=False path (gamma only, beta is None)
    w_nb = jax.random.uniform(k_w2, (output_dim, emb_dim), jnp.float32, -bound, bound)
    b_nb = jax.random.uniform(k_b2, (output_dim,), jnp.float32, -bound, bound)
    gamma_nb, beta_nb = film_forward(sigma_encoding, w_nb, b_nb,
                                     output_dim=output_dim, film_bias=False)
    gamma_nb = jax.block_until_ready(gamma_nb)
    g_ref_nb, _ = reference_film(sigma_encoding, w_nb, b_nb,
                                 output_dim=output_dim, film_bias=False)
    assert beta_nb is None
    assert gamma_nb.shape == (B, output_dim, 1)
    assert jnp.allclose(gamma_nb, g_ref_nb, atol=1e-5, rtol=1e-5)

    print("KERNEL_OK")
</pallas_src>

<mosaic_0001>
module attributes {stable_mosaic.version = 11 : i64} {
  func.func @_film_kernel_gamma_beta(%arg0: i32, %arg1: memref<8x32xf32, #tpu.memory_space<vmem>>, %arg2: memref<32x128xf32, #tpu.memory_space<vmem>>, %arg3: memref<32x128xf32, #tpu.memory_space<vmem>>, %arg4: memref<1x128xf32, #tpu.memory_space<vmem>>, %arg5: memref<1x128xf32, #tpu.memory_space<vmem>>, %arg6: memref<8x128xf32, #tpu.memory_space<vmem>>, %arg7: memref<8x128xf32, #tpu.memory_space<vmem>>) attributes {dimension_semantics = [#tpu.dimension_semantics<parallel>], iteration_bounds = array<i64: 1>, scalar_prefetch = 0 : i64, scratch_operands = 0 : i64, tpu.core_type = #tpu.core_type<tc>, window_params = [{transform_indices = @transform_0, window_bounds = array<i64: 8, 32>}, {pipeline_mode = #tpu.pipeline_mode<synchronous>, transform_indices = @transform_1, window_bounds = array<i64: 32, 128>}, {pipeline_mode = #tpu.pipeline_mode<synchronous>, transform_indices = @transform_2, window_bounds = array<i64: 32, 128>}, {pipeline_mode = #tpu.pipeline_mode<synchronous>, transform_indices = @transform_3, window_bounds = array<i64: 1, 128>}, {pipeline_mode = #tpu.pipeline_mode<synchronous>, transform_indices = @transform_4, window_bounds = array<i64: 1, 128>}, {transform_indices = @transform_5, window_bounds = array<i64: 8, 128>}, {transform_indices = @transform_6, window_bounds = array<i64: 8, 128>}]} {
    %c0 = arith.constant 0 : index
    %c0_0 = arith.constant 0 : index
    %0 = vector.load %arg1[%c0, %c0_0] : memref<8x32xf32, #tpu.memory_space<vmem>>, vector<8x32xf32>
    %c0_1 = arith.constant 0 : index
    %c0_2 = arith.constant 0 : index
    %1 = vector.load %arg2[%c0_1, %c0_2] : memref<32x128xf32, #tpu.memory_space<vmem>>, vector<32x128xf32>
    %cst = arith.constant dense<0.000000e+00> : vector<8x128xf32>
    %2 = tpu.matmul %0, %1, %cst {dimension_numbers = #tpu.dot_dimension_numbers<[1], [0], [0], [1], [0, 0, 1, 1], [], []>} : vector<8x32xf32>, vector<32x128xf32>, vector<8x128xf32> -> vector<8x128xf32>
    %c0_3 = arith.constant 0 : index
    %c0_4 = arith.constant 0 : index
    %3 = vector.load %arg4[%c0_3, %c0_4] : memref<1x128xf32, #tpu.memory_space<vmem>>, vector<1x128xf32>
    %4 = vector.broadcast %3 : vector<1x128xf32> to vector<8x128xf32>
    %5 = arith.addf %2, %4 : vector<8x128xf32>
    %c0_5 = arith.constant 0 : index
    %c0_6 = arith.constant 0 : index
    %6 = vector.load %arg6[%c0_5, %c0_6] : memref<8x128xf32, #tpu.memory_space<vmem>>, vector<8x128xf32>
    tpu.vector_store %arg6[%c0_5, %c0_6], %5 {strides = array<i32>} : memref<8x128xf32, #tpu.memory_space<vmem>>, vector<8x128xf32>,
    %c0_7 = arith.constant 0 : index
    %c0_8 = arith.constant 0 : index
    %7 = vector.load %arg3[%c0_7, %c0_8] : memref<32x128xf32, #tpu.memory_space<vmem>>, vector<32x128xf32>
    %cst_9 = arith.constant dense<0.000000e+00> : vector<8x128xf32>
    %8 = tpu.matmul %0, %7, %cst_9 {dimension_numbers = #tpu.dot_dimension_numbers<[1], [0], [0], [1], [0, 0, 1, 1], [], []>} : vector<8x32xf32>, vector<32x128xf32>, vector<8x128xf32> -> vector<8x128xf32>
    %c0_10 = arith.constant 0 : index
    %c0_11 = arith.constant 0 : index
    %9 = vector.load %arg5[%c0_10, %c0_11] : memref<1x128xf32, #tpu.memory_space<vmem>>, vector<1x128xf32>
    %10 = vector.broadcast %9 : vector<1x128xf32> to vector<8x128xf32>
    %11 = arith.addf %8, %10 : vector<8x128xf32>
    %c0_12 = arith.constant 0 : index
    %c0_13 = arith.constant 0 : index
    %12 = vector.load %arg7[%c0_12, %c0_13] : memref<8x128xf32, #tpu.memory_space<vmem>>, vector<8x128xf32>
    tpu.vector_store %arg7[%c0_12, %c0_13], %11 {strides = array<i32>} : memref<8x128xf32, #tpu.memory_space<vmem>>, vector<8x128xf32>,
    return
  }
  func.func @transform_0(%arg0: i32) -> (i32, i32) {
    %c0_i32 = arith.constant 0 : i32
    %c0_i32_0 = arith.constant 0 : i32
    return %arg0, %c0_i32 : i32, i32
  }
  func.func @transform_1(%arg0: i32) -> (i32, i32) {
    %c0_i32 = arith.constant 0 : i32
    %c0_i32_0 = arith.constant 0 : i32
    %c0_i32_1 = arith.constant 0 : i32
    return %c0_i32, %c0_i32_0 : i32, i32
  }
  func.func @transform_2(%arg0: i32) -> (i32, i32) {
    %c0_i32 = arith.constant 0 : i32
    %c0_i32_0 = arith.constant 0 : i32
    %c0_i32_1 = arith.constant 0 : i32
    return %c0_i32, %c0_i32_0 : i32, i32
  }
  func.func @transform_3(%arg0: i32) -> (i32, i32) {
    %c0_i32 = arith.constant 0 : i32
    %c0_i32_0 = arith.constant 0 : i32
    %c0_i32_1 = arith.constant 0 : i32
    return %c0_i32, %c0_i32_0 : i32, i32
  }
  func.func @transform_4(%arg0: i32) -> (i32, i32) {
    %c0_i32 = arith.constant 0 : i32
    %c0_i32_0 = arith.constant 0 : i32
    %c0_i32_1 = arith.constant 0 : i32
    return %c0_i32, %c0_i32_0 : i32, i32
  }
  func.func @transform_5(%arg0: i32) -> (i32, i32) {
    %c0_i32 = arith.constant 0 : i32
    %c0_i32_0 = arith.constant 0 : i32
    return %arg0, %c0_i32 : i32, i32
  }
  func.func @transform_6(%arg0: i32) -> (i32, i32) {
    %c0_i32 = arith.constant 0 : i32
    %c0_i32_0 = arith.constant 0 : i32
    return %arg0, %c0_i32 : i32, i32
  }
}

</mosaic_0001>

<bundles_post_ra>
// kernel: tpu_custom_call.1
= control target key start
LH: loop header
LB: loop body
LE: loop exit
PB: predicated region body
PF: predicated region fallthrough
CT: control target
= control target key end

     0   :  { %12 = vsyncpa [#allocation3], 0  ;;  %s480_s0 = inlined_call_operand.hbm [shape: f32[8,32], index: 0, kind: input, shape index: {}]   ;;  %s481_s1 = inlined_call_operand.hbm [shape: f32[32,128], index: 1, kind: input, shape index: {}]   ;;  %s482_s2 = inlined_call_operand.hbm [shape: f32[32,128], index: 2, kind: input, shape index: {}]   ;;  %s483_s3 = inlined_call_operand.vmem [shape: f32[1,128], index: 3, kind: input, shape index: {}]   ;;  %s484_s4 = inlined_call_operand.vmem [shape: f32[1,128], index: 4, kind: input, shape index: {}]   ;;  %s485_s5 = inlined_call_operand.hbm [shape: f32[8,128], index: 5, kind: output, shape index: {0}]   ;;  %s486_s6 = inlined_call_operand.hbm [shape: f32[8,128], index: 6, kind: output, shape index: {1}]  }
   0x1   :  { %13 = vsyncpa [#allocation6], 0 }
   0x2   :  { %14 = vsyncpa [#allocation4], 0 }
   0x3   :  { %15 = vsyncpa [#allocation10], 0  ;;  %s415_s21 = smov [#allocation5]  }
   0x4   :  { %s31_s22 = sshll.u32 %s415_s21, 4  ;;  %s32_s22 = int_to_ptr.vmem [resolvable:$true] %s31_s22 }
   0x5   :  { %s315_s23 = scalar_lea.vmem %s32_s22, 512  ;;  %p320_p1 = scmp.lt.s32.totalorder %s32_s22, %s32_s22 }
   0x6   :  { %p316_p0 = scmp.ne.s32.totalorder %s32_s22, %s315_s23  ;;  %p321_p2 = scmp.lt.s32.totalorder %s315_s23, %s315_s23 }
   0x8   :  { %p322_p3 = por %p321_p2, %p320_p1 }
   0xa   :  { %p323_p4 = pnand %p322_p3, %p316_p0 }
   0xc   :  { %326 = shalt.err (!%p323_p4)
}
   0xd   :  { %s416_s24 = smov 128   ;;  %s417_s25 = smov 8  }
   0xe   :  { %37 = dma.hbm_to_vmem [thread:$0]  %s481_s1, 512, %s32_s22, [#allocation6], %s416_s24, %s416_s24, %s417_s25  }
   0xf   :  { %s418_s28 = smov [#allocation2]   ;;  %s419_s30 = smov [#allocation7]  }
  0x10   :  { %s22_s29 = sshll.u32 %s418_s28, 4  ;;  %s43_s7 = sshll.u32 %s419_s30, 4  ;;  %s23_s29 = int_to_ptr.vmem [resolvable:$true] %s22_s29  ;;  %s44_s7 = int_to_ptr.vmem [resolvable:$true] %s43_s7 }
  0x11   :  { %s335_s8 = scalar_lea.vmem %s23_s29, 128  ;;  %p340_p6 = scmp.lt.s32.totalorder %s23_s29, %s23_s29 }
  0x12   :  { %p336_p5 = scmp.ne.s32.totalorder %s23_s29, %s335_s8  ;;  %p341_p7 = scmp.lt.s32.totalorder %s335_s8, %s335_s8 }
  0x14   :  { %p342_p8 = por %p341_p7, %p340_p6 }
  0x16   :  { %p343_p9 = pnand %p342_p8, %p336_p5 }
  0x18   :  { %346 = shalt.err (!%p343_p9)
}
  0x19   :  { %25 = dma.hbm_to_vmem [thread:$0]  %s480_s0, 128, %s23_s29, [#allocation3]  }
  0x1a   :  { %s355_s11 = scalar_lea.vmem %s44_s7, 512  ;;  %p360_p11 = scmp.lt.s32.totalorder %s44_s7, %s44_s7 }
  0x1b   :  { %p356_p10 = scmp.ne.s32.totalorder %s44_s7, %s355_s11  ;;  %p361_p12 = scmp.lt.s32.totalorder %s355_s11, %s355_s11 }
  0x1d   :  { %p362_p13 = por %p361_p12, %p360_p11 }
  0x1f   :  { %p363_p0 = pnand %p362_p13, %p356_p10 }
  0x21   :  { %366 = shalt.err (!%p363_p0)
}
  0x22   :  { %49 = dma.hbm_to_vmem [thread:$0]  %s482_s2, 512, %s44_s7, [#allocation6], %s416_s24, %s416_s24, %s417_s25  }
  0x23   :  { %407 = dma.done.wait [#allocation3], 128  }
  0x24   :  { %408 = vsyncadd [#allocation3], 4294967168 }
  0x25   :  { %409 = dma.done.wait [#allocation6], 1024  }
  0x26   :  { %410 = vsyncadd [#allocation6], 4294966272  ;;  %v420_v0 = vmov 0.0   ;;  %vm421_vm0 = vmmov 0   ;;  %v67_v1 = vld [vmem:[#allocation5 + $0x18] sm:$0xff]  ;;  %v66_v3 = vld [vmem:[#allocation5 + $0x10] sm:$0xff] }
  0x27   :  { %276 = vmatprep.subr.mxu0 %v420_v0  ;;  %287 = vmatprep.subr.mxu1 %v420_v0  ;;  %v153_v2 = vld [vmem:[#allocation7 + $0x18] sm:$0xff]  ;;  %v152_v4 = vld [vmem:[#allocation7 + $0x10] sm:$0xff]  ;;  %v65_v5 = vld [vmem:[#allocation5 + $0x8] sm:$0xff]  ;;  %vm75_vm1 = vcmask 261120   ;;  %s422_s15 = smov [#allocation8]   ;;  %s423_s17 = smov [#allocation9]  }
  0x28   :  { %284 = vmatprep.mubr.msk.f32.mxu0 %vm421_vm0, %v420_v0  ;;  %295 = vmatprep.mubr.msk.f32.mxu1 %vm421_vm0, %v420_v0  ;;  %v151_v6 = vld [vmem:[#allocation7 + $0x8] sm:$0xff]  ;;  %v64_v7 = vld [vmem:[#allocation5] sm:$0xff]  ;;  %v63_v9 = vld [vmem:[#allocation2] sm:$0xff]  ;;  %s238_s16 = sshll.u32 %s422_s15, 4  ;;  %s248_s18 = sshll.u32 %s423_s17, 4  ;;  %s239_s16 = int_to_ptr.vmem [resolvable:$true] %s238_s16  ;;  %s249_s18 = int_to_ptr.vmem [resolvable:$true] %s248_s18 }
  0x29   :  { %277 = vmatpush3.msra.mxu0 %v67_v1  ;;  %288 = vmatpush3.msra.mxu1 %v153_v2  ;;  %v150_v8 = vld [vmem:[#allocation7] sm:$0xff]  ;;  %v262_v10 = vld [vmem:[%s483_s3] ss:$0 sm:$0xff]  ;;  %s367_s19 = scalar_lea.vmem %s239_s16, 128  ;;  %p372_p2 = scmp.lt.s32.totalorder %s239_s16, %s239_s16 }
  0x2a   :  { %278 = vmatprep.subr.mxu0 %v420_v0  ;;  %289 = vmatprep.subr.mxu1 %v420_v0  ;;  %v264_v11 = vld [vmem:[%s484_s4] ss:$0 sm:$0xff]  ;;  %p368_p1 = scmp.ne.s32.totalorder %s239_s16, %s367_s19  ;;  %p373_p3 = scmp.lt.s32.totalorder %s367_s19, %s367_s19 }
  0x2b   :  { %279 = vmatpush3.msra.mxu0 %v66_v3  ;;  %290 = vmatpush3.msra.mxu1 %v152_v4 }
  0x2c   :  { %280 = vmatprep.subr.mxu0 %v420_v0  ;;  %291 = vmatprep.subr.mxu1 %v420_v0  ;;  %p374_p4 = por %p373_p3, %p372_p2 }
  0x2d   :  { %281 = vmatpush3.msra.mxu0 %v65_v5  ;;  %292 = vmatpush3.msra.mxu1 %v151_v6 }
  0x2e   :  { %282 = vmatprep.subr.mxu0 %v420_v0  ;;  %293 = vmatprep.subr.mxu1 %v420_v0  ;;  %p375_p5 = pnand %p374_p4, %p368_p1 }
  0x2f   :  { %283 = vmatpush3.msra.mxu0 %v64_v7  ;;  %294 = vmatpush3.msra.mxu1 %v150_v8 }
  0x30   :  { %285 = vmatmul.mubr.msk.f32.vlgmr.msra.gmra.mxu0 %vm75_vm1, %v63_v9  ;;  %296 = vmatmul.mubr.msk.f32.vlgmr.msra.gmra.mxu1 %vm75_vm1, %v63_v9 }
  0xf0   :  { %v145_v12 = vpop.f32.mrf.mxu0  ;;  %v227_v13 = vpop.f32.mrf.mxu1 }
  0xf1   :  { %v146_v14 = vadd.f32 %v262_v10, %v145_v12  ;;  %v228_v15 = vadd.f32 %v264_v11, %v227_v13 }
  0xf2   :  { %v286_v16 = vpop.f32.mrf.mxu0  ;;  %v297_v17 = vpop.f32.mrf.mxu1 }
  0xf3   :  { %149 = vst [vmem:[#allocation8] sm:$0xff] %v146_v14  ;;  %231 = vst [vmem:[#allocation9] sm:$0xff] %v228_v15 }
  0xf4   :  { %378 = shalt.err (!%p375_p5)
}
  0xf5   :  { %241 = dma.vmem_to_hbm [thread:$0]  %s239_s16, 128, %s485_s5, [#allocation4]  }
  0xf6   :  { %s387_s20 = scalar_lea.vmem %s249_s18, 128  ;;  %p392_p7 = scmp.lt.s32.totalorder %s249_s18, %s249_s18 }
  0xf7   :  { %p388_p6 = scmp.ne.s32.totalorder %s249_s18, %s387_s20  ;;  %p393_p8 = scmp.lt.s32.totalorder %s387_s20, %s387_s20 }
  0xf9   :  { %p394_p9 = por %p393_p8, %p392_p7 }
  0xfb   :  { %p395_p10 = pnand %p394_p9, %p388_p6 }
  0xfd   :  { %398 = shalt.err (!%p395_p10)
}
  0xfe   :  { %251 = dma.vmem_to_hbm [thread:$0]  %s249_s18, 128, %s486_s6, [#allocation10]  }
  0xff   :  { %411 = dma.done.wait [#allocation4], 128  }
 0x100   :  { %412 = vsyncadd [#allocation4], 4294967168 }
 0x101   :  { %413 = dma.done.wait [#allocation10], 128  }
 0x102   :  { %414 = vsyncadd [#allocation10], 4294967168 }
 0x103   :  { %258 = vsyncpa [#allocation3], 1 }
 0x104   :  { %259 = vsyncpa [#allocation6], 1 }
 0x105   :  { %260 = vsyncpa [#allocation4], 1 }
 0x106   :  { %261 = vsyncpa [#allocation10], 1 }

</bundles_post_ra>
